<compile_context>
chip_gen: v7x
topology: tpu7x:2x2x1
jax: 0.10.0
libtpu: 0.0.40
codegen_flags: <defaults>
</compile_context>

<pallas_src>
import functools

import jax
import jax.numpy as jnp
from jax.experimental import pallas as pl
from jax.experimental.pallas import tpu as pltpu


# ----------------------------- fused kernel ---------------------------------


def _baseline_resnet_kernel(
    x_ref,                      # (C, T) f32   image b, spatial tile t (lanes = spatial)
    w1_ref, b1_ref,             # (c1, C) f32,  (c1, 1) f32
    w2_ref, b2_ref,             # (c2, c1) bf16, (c2, 1) f32
    w3_ref, b3_ref,             # (c3, c2) bf16, (c3, 1) f32
    w4_ref, b4_ref,             # (c4, c3) bf16, (c4, 1) f32
    wo_ref, bo_ref,             # (n_class, D) f32, (n_class, 1) f32  (PyTorch Linear layout)
    o_ref,                      # (n_class, 1)  output for image b
    acc_ref,                    # (D, 1) VMEM scratch: running spatial sums of the 4 hooks
    *, c_in, chans, hw, hw_tile, inv_hw, needs_mask,
):
    c1, c2, c3, c4 = chans
    t = pl.program_id(1)

    @pl.when(t == 0)
    def _init():
        acc_ref[...] = jnp.zeros_like(acc_ref)

    x = x_ref[...]                                    # (C, T) f32

    # -- ResNet.layer1 stand-in: 1x1 conv C->c1 + ReLU.  K == c_in is tiny
    #    (3), so contract on the VPU with unrolled broadcast-FMAs.
    w1 = w1_ref[...]
    h1 = w1[:, 0:1] * x[0:1, :]
    for c in range(1, c_in):                          # static unroll (c_in is Python int)
        h1 = h1 + w1[:, c:c + 1] * x[c:c + 1, :]
    h1 = jnp.maximum(h1 + b1_ref[...], 0.0)           # (c1, T) f32

    # -- layer2..layer4 stand-ins: channel-major MXU matmuls, bf16 operands,
    #    f32 accumulation (M = C_out, K = C_in, N = spatial tile on lanes).
    # TODO(synk): on v6e/v7x the (32,16) layer2 contraction occupies <1% of the
    # 256x256 MXU; if profiling shows the vext slot binding, move it (and maybe
    # layer3) to unrolled VPU FMAs like layer1 (keep on MXU for v5e's 128x128).
    h2 = jnp.maximum(
        jnp.dot(w2_ref[...], h1.astype(jnp.bfloat16),
                preferred_element_type=jnp.float32) + b2_ref[...], 0.0)   # (c2, T)
    h3 = jnp.maximum(
        jnp.dot(w3_ref[...], h2.astype(jnp.bfloat16),
                preferred_element_type=jnp.float32) + b3_ref[...], 0.0)   # (c3, T)
    h4 = jnp.maximum(
        jnp.dot(w4_ref[...], h3.astype(jnp.bfloat16),
                preferred_element_type=jnp.float32) + b4_ref[...], 0.0)   # (c4, T)

    # -- LayerOut hooks: AdaptiveAvgPool2d(1) of every layer output.
    #    Accumulate spatial *sums* across HW tiles, slice-writing straight
    #    into the (D, 1) accumulator (no per-tile concat).  The last tile may
    #    extend past HW (cdiv grid): mask those columns out of the sums.
    if needs_mask:
        pos = t * hw_tile + jax.lax.broadcasted_iota(jnp.int32, (1, hw_tile), 1)
        valid = pos < hw                               # (1, T) bool

        def psum(h):
            return jnp.sum(jnp.where(valid, h, 0.0), axis=1, keepdims=True)
    else:
        def psum(h):
            return jnp.sum(h, axis=1, keepdims=True)

    acc_ref[0:c1, :] += psum(h1)
    acc_ref[c1:c1 + c2, :] += psum(h2)
    acc_ref[c1 + c2:c1 + c2 + c3, :] += psum(h3)
    acc_ref[c1 + c2 + c3:c1 + c2 + c3 + c4, :] += psum(h4)

    # -- last spatial tile: finish pooled concat + Linear + Sigmoid head.
    @pl.when(t == pl.num_programs(1) - 1)
    def _finalize():
        pooled = acc_ref[...] * inv_hw                 # (D, 1) == torch.cat of the GAPs
        logits = jnp.dot(wo_ref[...], pooled,
                         preferred_element_type=jnp.float32) + bo_ref[...]
        o_ref[...] = jax.nn.sigmoid(logits)            # (n_class, 1)


# ----------------------------- wrapper ---------------------------------------


def _pick_hw_tile(hw, max_tile=8192):
    """Spatial tile: whole image if it fits, else a large 128-aligned tile.

    8192 f32 spatial elements keep per-tile live data ~10 MiB (safe on v7x's
    64 MiB VMEM); `max_tile` can be raised on v5e/v6e if profiling shows
    exposed per-step overhead.  The last tile is masked in-kernel, so no
    divisor search / full-HW fallback is needed for ragged resolutions.
    """
    if hw <= max_tile:
        return hw
    return max_tile - (max_tile % 128) if max_tile >= 128 else 128


def baseline_resnet_forward(x, params, input_num=None, *, hw_tile=None):
    """Forward pass of Baseline_ResNet.  x: (B, C, H, W) float32 (NCHW).

    `input_num` is accepted and ignored, matching the PyTorch forward.
    Note (v7x): only the batch axis is "parallel", so B >= 2 is needed to use
    both TensorCores of a v7x chip.
    """
    del input_num
    B, C, H, W = x.shape
    HW = H * W

    c1 = params["w1"].shape[0]
    c2 = params["w2"].shape[0]
    c3 = params["w3"].shape[0]
    c4 = params["w4"].shape[0]
    n_class, pretrain_dim = params["wo"].shape
    D = c1 + c2 + c3 + c4
    assert pretrain_dim == D

    if hw_tile is None or hw_tile <= 0 or (hw_tile != HW and hw_tile % 128 != 0):
        hw_tile = _pick_hw_tile(HW)
    hw_tile = min(hw_tile, HW)
    n_tiles = pl.cdiv(HW, hw_tile)
    needs_mask = (HW % hw_tile) != 0

    # Scoped-VMEM budget for the chosen tile: double-buffered f32 input,
    # f32 h1..h4, bf16 copies of h1..h3, plus weights / temps slack.
    tile_bytes = hw_tile * (2 * C * 4 + D * 4 + (c1 + c2 + c3) * 2)
    vmem_limit = min(max(int(tile_bytes * 1.5) + (4 << 20), 32 << 20), 48 << 20)

    x_flat = x.reshape(B, C, HW).astype(jnp.float32)   # free reshape, no transpose

    # bf16 MXU operands (f32 accumulation is kept inside the kernel).
    w2 = params["w2"].astype(jnp.bfloat16)
    w3 = params["w3"].astype(jnp.bfloat16)
    w4 = params["w4"].astype(jnp.bfloat16)

    def _w_spec(shape):
        return pl.BlockSpec(shape, lambda b, t: (0, 0))

    kernel = functools.partial(
        _baseline_resnet_kernel,
        c_in=C, chans=(c1, c2, c3, c4), hw=HW, hw_tile=hw_tile,
        inv_hw=1.0 / HW, needs_mask=needs_mask)

    out = pl.pallas_call(
        kernel,
        out_shape=jax.ShapeDtypeStruct((B, n_class, 1), jnp.float32),
        grid_spec=pltpu.PrefetchScalarGridSpec(
            num_scalar_prefetch=0,
            grid=(B, n_tiles),
            in_specs=[
                # image b, spatial tile t; spatial stays on the 128-lane axis
                pl.BlockSpec((None, C, hw_tile), lambda b, t: (b, 0, t)),
                _w_spec(params["w1"].shape), _w_spec(params["b1"].shape),
                _w_spec(w2.shape), _w_spec(params["b2"].shape),
                _w_spec(w3.shape), _w_spec(params["b3"].shape),
                _w_spec(w4.shape), _w_spec(params["b4"].shape),
                _w_spec(params["wo"].shape), _w_spec(params["bo"].shape),
            ],
            out_specs=pl.BlockSpec((None, n_class, 1), lambda b, t: (b, 0, 0)),
            scratch_shapes=[pltpu.VMEM((D, 1), jnp.float32)],
        ),
        compiler_params=pltpu.CompilerParams(
            dimension_semantics=("parallel", "arbitrary"),
            vmem_limit_bytes=vmem_limit),
    )(x_flat, params["w1"], params["b1"], w2, params["b2"],
      w3, params["b3"], w4, params["b4"],
      params["wo"], params["bo"])

    return out.reshape(B, n_class)


# ----------------------------- params & reference -----------------------------


def init_params(key, c_in=3, channels=(16, 32, 64, 128), n_class=5):
    c1, c2, c3, c4 = channels
    pretrain_dim = c1 + c2 + c3 + c4
    k1, k2, k3, k4, k5 = jax.random.split(key, 5)

    def he(k, shape):
        return jax.random.normal(k, shape, jnp.float32) * (2.0 / shape[1]) ** 0.5

    return {
        # ResNet layer1..layer4 stand-ins (1x1 conv weights, channel-major).
        "w1": he(k1, (c1, c_in)), "b1": jnp.zeros((c1, 1), jnp.float32),
        "w2": he(k2, (c2, c1)),   "b2": jnp.zeros((c2, 1), jnp.float32),
        "w3": he(k3, (c3, c2)),   "b3": jnp.zeros((c3, 1), jnp.float32),
        "w4": he(k4, (c4, c3)),   "b4": jnp.zeros((c4, 1), jnp.float32),
        # OutputLayer: nn.Linear(pretrain_dim, n_class) in PyTorch layout,
        # nn.init.normal_(weight, 0, 0.1), nn.init.constant_(bias, 0).
        "wo": jax.random.normal(k5, (n_class, pretrain_dim), jnp.float32) * 0.1,
        "bo": jnp.zeros((n_class, 1), jnp.float32),
    }


def _reference_forward(x, params):
    """Pure-JAX f32 reference of the same forward (for correctness checking)."""
    B, C, H, W = x.shape
    hp = jax.lax.Precision.HIGHEST
    xr = x.reshape(B, C, H * W).astype(jnp.float32)

    def block(h, w, b):
        return jax.nn.relu(jnp.einsum("oc,bcs->bos", w, h, precision=hp) + b[None])

    h1 = block(xr, params["w1"], params["b1"])
    h2 = block(h1, params["w2"], params["b2"])
    h3 = block(h2, params["w3"], params["b3"])
    h4 = block(h3, params["w4"], params["b4"])
    pooled = jnp.concatenate([h.mean(axis=2) for h in (h1, h2, h3, h4)], axis=1)
    logits = jnp.einsum("bd,od->bo", pooled, params["wo"], precision=hp)
    return jax.nn.sigmoid(logits + params["bo"][:, 0][None])


if __name__ == "__main__":
    key = jax.random.PRNGKey(0)
    kx1, kx2, kp = jax.random.split(key, 3)

    n_class = 5
    params = init_params(kp, c_in=3, channels=(16, 32, 64, 128), n_class=n_class)
    fwd = jax.jit(baseline_resnet_forward, static_argnames=("hw_tile",))

    # Tolerance is dominated by bf16 MXU operands (f32 accumulation); the
    # pooled accumulator, 1/HW scale, and Linear+Sigmoid head stay in f32.
    TOL = 1e-2

    # Case 1: aligned spatial tiling (HW=256, hw_tile=128 -> 2 full tiles,
    # exercising the accumulator / pl.when init-finalize path).
    x1 = jax.random.normal(kx1, (2, 3, 16, 16), jnp.float32)
    out1 = jax.block_until_ready(fwd(x1, params, hw_tile=128))
    assert out1.shape == (2, n_class), out1.shape
    assert bool(jnp.all(jnp.isfinite(out1)))
    ref1 = _reference_forward(x1, params)
    assert bool(jnp.allclose(out1, ref1, atol=TOL, rtol=TOL)), (
        float(jnp.max(jnp.abs(out1 - ref1))))

    # Case 2: ragged spatial extent (HW=324, hw_tile=128 -> cdiv grid of 3,
    # masked last tile path).
    x2 = jax.random.normal(kx2, (2, 3, 18, 18), jnp.float32)
    out2 = jax.block_until_ready(fwd(x2, params, hw_tile=128))
    assert out2.shape == (2, n_class), out2.shape
    assert bool(jnp.all(jnp.isfinite(out2)))
    ref2 = _reference_forward(x2, params)
    assert bool(jnp.allclose(out2, ref2, atol=TOL, rtol=TOL)), (
        float(jnp.max(jnp.abs(out2 - ref2))))

    print("KERNEL_OK")
</pallas_src>

<mosaic_0001>
module attributes {stable_mosaic.version = 11 : i64} {
  func.func @_baseline_resnet_kernel(%arg0: i32, %arg1: i32, %arg2: memref<1x3x128xf32, #tpu.memory_space<vmem>>, %arg3: memref<16x3xf32, #tpu.memory_space<vmem>>, %arg4: memref<16x1xf32, #tpu.memory_space<vmem>>, %arg5: memref<32x16xbf16, #tpu.memory_space<vmem>>, %arg6: memref<32x1xf32, #tpu.memory_space<vmem>>, %arg7: memref<64x32xbf16, #tpu.memory_space<vmem>>, %arg8: memref<64x1xf32, #tpu.memory_space<vmem>>, %arg9: memref<128x64xbf16, #tpu.memory_space<vmem>>, %arg10: memref<128x1xf32, #tpu.memory_space<vmem>>, %arg11: memref<5x240xf32, #tpu.memory_space<vmem>>, %arg12: memref<5x1xf32, #tpu.memory_space<vmem>>, %arg13: memref<1x5x1xf32, #tpu.memory_space<vmem>>, %arg14: memref<240x1xf32, #tpu.memory_space<vmem>>) attributes {dimension_semantics = [#tpu.dimension_semantics<parallel>, #tpu.dimension_semantics<arbitrary>], iteration_bounds = array<i64: 2, 2>, scalar_prefetch = 0 : i64, scratch_operands = 1 : i64, tpu.core_type = #tpu.core_type<tc>, window_params = [{transform_indices = @transform_0, window_bounds = array<i64: 1, 3, 128>}, {pipeline_mode = #tpu.pipeline_mode<synchronous>, transform_indices = @transform_1, window_bounds = array<i64: 16, 3>}, {pipeline_mode = #tpu.pipeline_mode<synchronous>, transform_indices = @transform_2, window_bounds = array<i64: 16, 1>}, {pipeline_mode = #tpu.pipeline_mode<synchronous>, transform_indices = @transform_3, window_bounds = array<i64: 32, 16>}, {pipeline_mode = #tpu.pipeline_mode<synchronous>, transform_indices = @transform_4, window_bounds = array<i64: 32, 1>}, {pipeline_mode = #tpu.pipeline_mode<synchronous>, transform_indices = @transform_5, window_bounds = array<i64: 64, 32>}, {pipeline_mode = #tpu.pipeline_mode<synchronous>, transform_indices = @transform_6, window_bounds = array<i64: 64, 1>}, {pipeline_mode = #tpu.pipeline_mode<synchronous>, transform_indices = @transform_7, window_bounds = array<i64: 128, 64>}, {pipeline_mode = #tpu.pipeline_mode<synchronous>, transform_indices = @transform_8, window_bounds = array<i64: 128, 1>}, {pipeline_mode = #tpu.pipeline_mode<synchronous>, transform_indices = @transform_9, window_bounds = array<i64: 5, 240>}, {pipeline_mode = #tpu.pipeline_mode<synchronous>, transform_indices = @transform_10, window_bounds = array<i64: 5, 1>}, {transform_indices = @transform_11, window_bounds = array<i64: 1, 5, 1>}]} {
    %c0_i32 = arith.constant 0 : i32
    %0 = arith.cmpi eq, %arg1, %c0_i32 : i32
    %1 = arith.extui %0 : i1 to i32
    %c0_i32_0 = arith.constant 0 : i32
    %2 = arith.cmpi ne, %1, %c0_i32_0 : i32
    scf.if %2 {
      %cst_43 = arith.constant 0.000000e+00 : f32
      %75 = vector.broadcast %cst_43 : f32 to vector<240x1xf32>
      %c0_44 = arith.constant 0 : index
      %c0_45 = arith.constant 0 : index
      %76 = vector.load %arg14[%c0_44, %c0_45] : memref<240x1xf32, #tpu.memory_space<vmem>>, vector<240x1xf32>
      tpu.vector_store %arg14[%c0_44, %c0_45], %75 {strides = array<i32>} : memref<240x1xf32, #tpu.memory_space<vmem>>, vector<240x1xf32>,
    } else {
    }
    %c0 = arith.constant 0 : index
    %c0_1 = arith.constant 0 : index
    %c0_2 = arith.constant 0 : index
    %3 = vector.load %arg2[%c0, %c0_1, %c0_2] : memref<1x3x128xf32, #tpu.memory_space<vmem>>, vector<1x3x128xf32>
    %4 = vector.shape_cast %3 : vector<1x3x128xf32> to vector<3x128xf32>
    %c0_3 = arith.constant 0 : index
    %c0_4 = arith.constant 0 : index
    %5 = vector.load %arg3[%c0_3, %c0_4] : memref<16x3xf32, #tpu.memory_space<vmem>>, vector<16x3xf32>
    %6 = vector.extract_strided_slice %5 {offsets = [0, 0], sizes = [16, 1], strides = [1, 1]} : vector<16x3xf32> to vector<16x1xf32>
    %7 = vector.extract_strided_slice %4 {offsets = [0, 0], sizes = [1, 128], strides = [1, 1]} : vector<3x128xf32> to vector<1x128xf32>
    %8 = vector.broadcast %6 : vector<16x1xf32> to vector<16x128xf32>
    %9 = vector.broadcast %7 : vector<1x128xf32> to vector<16x128xf32>
    %10 = arith.mulf %8, %9 : vector<16x128xf32>
    %11 = vector.extract_strided_slice %5 {offsets = [0, 1], sizes = [16, 1], strides = [1, 1]} : vector<16x3xf32> to vector<16x1xf32>
    %12 = vector.extract_strided_slice %4 {offsets = [1, 0], sizes = [1, 128], strides = [1, 1]} : vector<3x128xf32> to vector<1x128xf32>
    %13 = vector.broadcast %11 : vector<16x1xf32> to vector<16x128xf32>
    %14 = vector.broadcast %12 : vector<1x128xf32> to vector<16x128xf32>
    %15 = arith.mulf %13, %14 : vector<16x128xf32>
    %16 = arith.addf %10, %15 : vector<16x128xf32>
    %17 = vector.extract_strided_slice %5 {offsets = [0, 2], sizes = [16, 1], strides = [1, 1]} : vector<16x3xf32> to vector<16x1xf32>
    %18 = vector.extract_strided_slice %4 {offsets = [2, 0], sizes = [1, 128], strides = [1, 1]} : vector<3x128xf32> to vector<1x128xf32>
    %19 = vector.broadcast %17 : vector<16x1xf32> to vector<16x128xf32>
    %20 = vector.broadcast %18 : vector<1x128xf32> to vector<16x128xf32>
    %21 = arith.mulf %19, %20 : vector<16x128xf32>
    %22 = arith.addf %16, %21 : vector<16x128xf32>
    %c0_5 = arith.constant 0 : index
    %c0_6 = arith.constant 0 : index
    %23 = vector.load %arg4[%c0_5, %c0_6] : memref<16x1xf32, #tpu.memory_space<vmem>>, vector<16x1xf32>
    %24 = vector.broadcast %23 : vector<16x1xf32> to vector<16x128xf32>
    %25 = arith.addf %22, %24 : vector<16x128xf32>
    %cst = arith.constant 0.000000e+00 : f32
    %26 = vector.broadcast %cst : f32 to vector<16x128xf32>
    %27 = arith.maximumf %25, %26 : vector<16x128xf32>
    %c0_7 = arith.constant 0 : index
    %c0_8 = arith.constant 0 : index
    %28 = vector.load %arg5[%c0_7, %c0_8] : memref<32x16xbf16, #tpu.memory_space<vmem>>, vector<32x16xbf16>
    %29 = arith.truncf %27 : vector<16x128xf32> to vector<16x128xbf16>
    %cst_9 = arith.constant dense<0.000000e+00> : vector<32x128xf32>
    %30 = tpu.matmul %28, %29, %cst_9 {dimension_numbers = #tpu.dot_dimension_numbers<[1], [0], [0], [1], [0, 0, 1, 1], [], []>} : vector<32x16xbf16>, vector<16x128xbf16>, vector<32x128xf32> -> vector<32x128xf32>
    %c0_10 = arith.constant 0 : index
    %c0_11 = arith.constant 0 : index
    %31 = vector.load %arg6[%c0_10, %c0_11] : memref<32x1xf32, #tpu.memory_space<vmem>>, vector<32x1xf32>
    %32 = vector.broadcast %31 : vector<32x1xf32> to vector<32x128xf32>
    %33 = arith.addf %30, %32 : vector<32x128xf32>
    %cst_12 = arith.constant 0.000000e+00 : f32
    %34 = vector.broadcast %cst_12 : f32 to vector<32x128xf32>
    %35 = arith.maximumf %33, %34 : vector<32x128xf32>
    %c0_13 = arith.constant 0 : index
    %c0_14 = arith.constant 0 : index
    %36 = vector.load %arg7[%c0_13, %c0_14] : memref<64x32xbf16, #tpu.memory_space<vmem>>, vector<64x32xbf16>
    %37 = arith.truncf %35 : vector<32x128xf32> to vector<32x128xbf16>
    %cst_15 = arith.constant dense<0.000000e+00> : vector<64x128xf32>
    %38 = tpu.matmul %36, %37, %cst_15 {dimension_numbers = #tpu.dot_dimension_numbers<[1], [0], [0], [1], [0, 0, 1, 1], [], []>} : vector<64x32xbf16>, vector<32x128xbf16>, vector<64x128xf32> -> vector<64x128xf32>
    %c0_16 = arith.constant 0 : index
    %c0_17 = arith.constant 0 : index
    %39 = vector.load %arg8[%c0_16, %c0_17] : memref<64x1xf32, #tpu.memory_space<vmem>>, vector<64x1xf32>
    %40 = vector.broadcast %39 : vector<64x1xf32> to vector<64x128xf32>
    %41 = arith.addf %38, %40 : vector<64x128xf32>
    %cst_18 = arith.constant 0.000000e+00 : f32
    %42 = vector.broadcast %cst_18 : f32 to vector<64x128xf32>
    %43 = arith.maximumf %41, %42 : vector<64x128xf32>
    %c0_19 = arith.constant 0 : index
    %c0_20 = arith.constant 0 : index
    %44 = vector.load %arg9[%c0_19, %c0_20] : memref<128x64xbf16, #tpu.memory_space<vmem>>, vector<128x64xbf16>
    %45 = arith.truncf %43 : vector<64x128xf32> to vector<64x128xbf16>
    %cst_21 = arith.constant dense<0.000000e+00> : vector<128x128xf32>
    %46 = tpu.matmul %44, %45, %cst_21 {dimension_numbers = #tpu.dot_dimension_numbers<[1], [0], [0], [1], [0, 0, 1, 1], [], []>} : vector<128x64xbf16>, vector<64x128xbf16>, vector<128x128xf32> -> vector<128x128xf32>
    %c0_22 = arith.constant 0 : index
    %c0_23 = arith.constant 0 : index
    %47 = vector.load %arg10[%c0_22, %c0_23] : memref<128x1xf32, #tpu.memory_space<vmem>>, vector<128x1xf32>
    %48 = vector.broadcast %47 : vector<128x1xf32> to vector<128x128xf32>
    %49 = arith.addf %46, %48 : vector<128x128xf32>
    %cst_24 = arith.constant 0.000000e+00 : f32
    %50 = vector.broadcast %cst_24 : f32 to vector<128x128xf32>
    %51 = arith.maximumf %49, %50 : vector<128x128xf32>
    %c0_25 = arith.constant 0 : index
    %c0_26 = arith.constant 0 : index
    %52 = vector.load %arg14[%c0_25, %c0_26] : memref<240x1xf32, #tpu.memory_space<vmem>>, vector<16x1xf32>
    %cst_27 = arith.constant dense<0.000000e+00> : vector<16xf32>
    %53 = vector.multi_reduction <add>, %27, %cst_27 [1] : vector<16x128xf32> to vector<16xf32>
    %54 = vector.shape_cast %53 : vector<16xf32> to vector<16x1xf32>
    %55 = arith.addf %52, %54 : vector<16x1xf32>
    %c0_28 = arith.constant 0 : index
    %c0_29 = arith.constant 0 : index
    %56 = vector.load %arg14[%c0_28, %c0_29] : memref<240x1xf32, #tpu.memory_space<vmem>>, vector<16x1xf32>
    tpu.vector_store %arg14[%c0_28, %c0_29], %55 {strides = array<i32>} : memref<240x1xf32, #tpu.memory_space<vmem>>, vector<16x1xf32>,
    %c16 = arith.constant 16 : index
    %c0_30 = arith.constant 0 : index
    %57 = vector.load %arg14[%c16, %c0_30] : memref<240x1xf32, #tpu.memory_space<vmem>>, vector<32x1xf32>
    %cst_31 = arith.constant dense<0.000000e+00> : vector<32xf32>
    %58 = vector.multi_reduction <add>, %35, %cst_31 [1] : vector<32x128xf32> to vector<32xf32>
    %59 = vector.shape_cast %58 : vector<32xf32> to vector<32x1xf32>
    %60 = arith.addf %57, %59 : vector<32x1xf32>
    %c16_32 = arith.constant 16 : index
    %c0_33 = arith.constant 0 : index
    %61 = vector.load %arg14[%c16_32, %c0_33] : memref<240x1xf32, #tpu.memory_space<vmem>>, vector<32x1xf32>
    tpu.vector_store %arg14[%c16_32, %c0_33], %60 {strides = array<i32>} : memref<240x1xf32, #tpu.memory_space<vmem>>, vector<32x1xf32>,
    %c48 = arith.constant 48 : index
    %c0_34 = arith.constant 0 : index
    %62 = vector.load %arg14[%c48, %c0_34] : memref<240x1xf32, #tpu.memory_space<vmem>>, vector<64x1xf32>
    %cst_35 = arith.constant dense<0.000000e+00> : vector<64xf32>
    %63 = vector.multi_reduction <add>, %43, %cst_35 [1] : vector<64x128xf32> to vector<64xf32>
    %64 = vector.shape_cast %63 : vector<64xf32> to vector<64x1xf32>
    %65 = arith.addf %62, %64 : vector<64x1xf32>
    %c48_36 = arith.constant 48 : index
    %c0_37 = arith.constant 0 : index
    %66 = vector.load %arg14[%c48_36, %c0_37] : memref<240x1xf32, #tpu.memory_space<vmem>>, vector<64x1xf32>
    tpu.vector_store %arg14[%c48_36, %c0_37], %65 {strides = array<i32>} : memref<240x1xf32, #tpu.memory_space<vmem>>, vector<64x1xf32>,
    %c112 = arith.constant 112 : index
    %c0_38 = arith.constant 0 : index
    %67 = vector.load %arg14[%c112, %c0_38] : memref<240x1xf32, #tpu.memory_space<vmem>>, vector<128x1xf32>
    %cst_39 = arith.constant dense<0.000000e+00> : vector<128xf32>
    %68 = vector.multi_reduction <add>, %51, %cst_39 [1] : vector<128x128xf32> to vector<128xf32>
    %69 = vector.shape_cast %68 : vector<128xf32> to vector<128x1xf32>
    %70 = arith.addf %67, %69 : vector<128x1xf32>
    %c112_40 = arith.constant 112 : index
    %c0_41 = arith.constant 0 : index
    %71 = vector.load %arg14[%c112_40, %c0_41] : memref<240x1xf32, #tpu.memory_space<vmem>>, vector<128x1xf32>
    tpu.vector_store %arg14[%c112_40, %c0_41], %70 {strides = array<i32>} : memref<240x1xf32, #tpu.memory_space<vmem>>, vector<128x1xf32>,
    %c1_i32 = arith.constant 1 : i32
    %72 = arith.cmpi eq, %arg1, %c1_i32 : i32
    %73 = arith.extui %72 : i1 to i32
    %c0_i32_42 = arith.constant 0 : i32
    %74 = arith.cmpi ne, %73, %c0_i32_42 : i32
    scf.if %74 {
      %c0_43 = arith.constant 0 : index
      %c0_44 = arith.constant 0 : index
      %75 = vector.load %arg14[%c0_43, %c0_44] : memref<240x1xf32, #tpu.memory_space<vmem>>, vector<240x1xf32>
      %cst_45 = arith.constant 3.906250e-03 : f32
      %76 = vector.broadcast %cst_45 : f32 to vector<240x1xf32>
      %77 = arith.mulf %75, %76 : vector<240x1xf32>
      %c0_46 = arith.constant 0 : index
      %c0_47 = arith.constant 0 : index
      %78 = vector.load %arg11[%c0_46, %c0_47] : memref<5x240xf32, #tpu.memory_space<vmem>>, vector<5x240xf32>
      %cst_48 = arith.constant dense<0.000000e+00> : vector<5x1xf32>
      %79 = tpu.matmul %78, %77, %cst_48 {dimension_numbers = #tpu.dot_dimension_numbers<[1], [0], [0], [1], [0, 0, 1, 1], [], []>} : vector<5x240xf32>, vector<240x1xf32>, vector<5x1xf32> -> vector<5x1xf32>
      %c0_49 = arith.constant 0 : index
      %c0_50 = arith.constant 0 : index
      %80 = vector.load %arg12[%c0_49, %c0_50] : memref<5x1xf32, #tpu.memory_space<vmem>>, vector<5x1xf32>
      %81 = arith.addf %79, %80 : vector<5x1xf32>
      %82 = arith.negf %81 : vector<5x1xf32>
      %83 = math.exp %82 : vector<5x1xf32>
      %cst_51 = arith.constant 1.000000e+00 : f32
      %84 = vector.broadcast %cst_51 : f32 to vector<5x1xf32>
      %85 = arith.addf %84, %83 : vector<5x1xf32>
      %86 = arith.divf %84, %85 : vector<5x1xf32>
      %c0_52 = arith.constant 0 : index
      %c0_53 = arith.constant 0 : index
      %c0_54 = arith.constant 0 : index
      %87 = vector.load %arg13[%c0_52, %c0_53, %c0_54] : memref<1x5x1xf32, #tpu.memory_space<vmem>>, vector<1x5x1xf32>
      %88 = vector.shape_cast %87 : vector<1x5x1xf32> to vector<5x1xf32>
      %89 = vector.shape_cast %86 : vector<5x1xf32> to vector<1x5x1xf32>
      tpu.vector_store %arg13[%c0_52, %c0_53, %c0_54], %89 {strides = array<i32>} : memref<1x5x1xf32, #tpu.memory_space<vmem>>, vector<1x5x1xf32>,
    } else {
    }
    return
  }
  func.func @transform_0(%arg0: i32, %arg1: i32) -> (i32, i32, i32) {
    %c0_i32 = arith.constant 0 : i32
    %c0_i32_0 = arith.constant 0 : i32
    return %arg0, %c0_i32, %arg1 : i32, i32, i32
  }
  func.func @transform_1(%arg0: i32, %arg1: i32) -> (i32, i32) {
    %c0_i32 = arith.constant 0 : i32
    %c0_i32_0 = arith.constant 0 : i32
    %c0_i32_1 = arith.constant 0 : i32
    return %c0_i32, %c0_i32_0 : i32, i32
  }
  func.func @transform_2(%arg0: i32, %arg1: i32) -> (i32, i32) {
    %c0_i32 = arith.constant 0 : i32
    %c0_i32_0 = arith.constant 0 : i32
    %c0_i32_1 = arith.constant 0 : i32
    return %c0_i32, %c0_i32_0 : i32, i32
  }
  func.func @transform_3(%arg0: i32, %arg1: i32) -> (i32, i32) {
    %c0_i32 = arith.constant 0 : i32
    %c0_i32_0 = arith.constant 0 : i32
    %c0_i32_1 = arith.constant 0 : i32
    return %c0_i32, %c0_i32_0 : i32, i32
  }
  func.func @transform_4(%arg0: i32, %arg1: i32) -> (i32, i32) {
    %c0_i32 = arith.constant 0 : i32
    %c0_i32_0 = arith.constant 0 : i32
    %c0_i32_1 = arith.constant 0 : i32
    return %c0_i32, %c0_i32_0 : i32, i32
  }
  func.func @transform_5(%arg0: i32, %arg1: i32) -> (i32, i32) {
    %c0_i32 = arith.constant 0 : i32
    %c0_i32_0 = arith.constant 0 : i32
    %c0_i32_1 = arith.constant 0 : i32
    return %c0_i32, %c0_i32_0 : i32, i32
  }
  func.func @transform_6(%arg0: i32, %arg1: i32) -> (i32, i32) {
    %c0_i32 = arith.constant 0 : i32
    %c0_i32_0 = arith.constant 0 : i32
    %c0_i32_1 = arith.constant 0 : i32
    return %c0_i32, %c0_i32_0 : i32, i32
  }
  func.func @transform_7(%arg0: i32, %arg1: i32) -> (i32, i32) {
    %c0_i32 = arith.constant 0 : i32
    %c0_i32_0 = arith.constant 0 : i32
    %c0_i32_1 = arith.constant 0 : i32
    return %c0_i32, %c0_i32_0 : i32, i32
  }
  func.func @transform_8(%arg0: i32, %arg1: i32) -> (i32, i32) {
    %c0_i32 = arith.constant 0 : i32
    %c0_i32_0 = arith.constant 0 : i32
    %c0_i32_1 = arith.constant 0 : i32
    return %c0_i32, %c0_i32_0 : i32, i32
  }
  func.func @transform_9(%arg0: i32, %arg1: i32) -> (i32, i32) {
    %c0_i32 = arith.constant 0 : i32
    %c0_i32_0 = arith.constant 0 : i32
    %c0_i32_1 = arith.constant 0 : i32
    return %c0_i32, %c0_i32_0 : i32, i32
  }
  func.func @transform_10(%arg0: i32, %arg1: i32) -> (i32, i32) {
    %c0_i32 = arith.constant 0 : i32
    %c0_i32_0 = arith.constant 0 : i32
    %c0_i32_1 = arith.constant 0 : i32
    return %c0_i32, %c0_i32_0 : i32, i32
  }
  func.func @transform_11(%arg0: i32, %arg1: i32) -> (i32, i32, i32) {
    %c0_i32 = arith.constant 0 : i32
    %c0_i32_0 = arith.constant 0 : i32
    %c0_i32_1 = arith.constant 0 : i32
    return %arg0, %c0_i32, %c0_i32_0 : i32, i32, i32
  }
}

</mosaic_0001>

<bundles_post_ra>
// kernel: baseline_resnet_forward.1
= control target key start
LH: loop header
LB: loop body
LE: loop exit
PB: predicated region body
PF: predicated region fallthrough
CT: control target
= control target key end

     0   :  { %s1770_s17 = smov 0   ;;  %s1772_s18 = smov 0   ;;  %s2141_s0 = inlined_call_operand.vmem [shape: f32[2,3,256], index: 0, kind: input, shape index: {}]   ;;  %s2142_s1 = inlined_call_operand.vmem [shape: f32[16,3], index: 1, kind: input, shape index: {}]   ;;  %s2143_s2 = inlined_call_operand.vmem [shape: f32[16,1], index: 2, kind: input, shape index: {}]   ;;  %s2144_s3 = inlined_call_operand.vmem [shape: bf16[32,16], index: 3, kind: input, shape index: {}]   ;;  %s2145_s4 = inlined_call_operand.vmem [shape: f32[32,1], index: 4, kind: input, shape index: {}]   ;;  %s2146_s5 = inlined_call_operand.vmem [shape: bf16[64,32], index: 5, kind: input, shape index: {}]   ;;  %s2147_s6 = inlined_call_operand.vmem [shape: f32[64,1], index: 6, kind: input, shape index: {}]   ;;  %s2148_s7 = inlined_call_operand.vmem [shape: bf16[128,64], index: 7, kind: input, shape index: {}]   ;;  %s2149_s8 = inlined_call_operand.vmem [shape: f32[128,1], index: 8, kind: input, shape index: {}]   ;;  %s2150_s9 = inlined_call_operand.vmem [shape: f32[5,240], index: 9, kind: input, shape index: {}]   ;;  %s2151_s10 = inlined_call_operand.vmem [shape: f32[5,1], index: 10, kind: input, shape index: {}]   ;;  %s2152_s11 = inlined_call_operand.vmem [shape: f32[2,5,1], index: 11, kind: output, shape index: {}]  }
   0x1   :  { %s1774_s19 = smov 0   ;;  %s1776_s20 = smov 0  }
   0x2   :  { %s1778_s21 = smov 0  }
   0x3 LB: > { %s30_s22 = sadd.s32 1, %s1695_s19  ;;  %s33_s23 = sadd.s32 1, %s1699_s20  ;;  %s1703_s21 = sphi %s1778_s21, %s21_s21   ;;  %s1699_s20 = sphi %s1776_s20, %s2156_s20   ;;  %s1695_s19 = sphi %s1774_s19, %s2155_s19   ;;  %s1691_s18 = sphi %s1772_s18, %s2154_s18   ;;  %s1687_s17 = sphi %s1770_s17, %s2153_s17  }
   0x4   : > { %p31_p0 = scmp.ge.s32.totalorder %s30_s22, 2  ;;  %p1442_p1 = scmp.ge.s32.totalorder %s1703_s21, 1 }
   0x5   : > { %p354_p2 = scmp.lt.s32.totalorder %s1703_s21, 5 }
   0x6   : > { %s2158_s22 = smov (%p31_p0, %s30_s22), 0  ;;  %s2160_s23 = smov (!%p31_p0, %s33_s23), %s1699_s20 }
   0x7   : > { %p355_p3 = pnand %p1442_p1, %p354_p2  ;;  %p35_p4 = scmp.ge.s32.totalorder %s2160_s23, 2 }
   0x8   : > { %p396_p5 = scmp.lt.s32.totalorder (!%p355_p3), %s1691_s18, 1  ;;  %p398_p6 = scmp.lt.s32.totalorder (!%p355_p3), %s1687_s17, 1 }
   0x9   : > { %s2162_s23 = smov (%p35_p4, %s2160_s23), 0  ;;  %358 = sbr.rel (%p355_p3) target bundleno = 1308 (0x51c), region = 64 }
   0xa   : > { %p1446_p7 = scmp.ne.s32.totalorder (!%p355_p3), %s1687_s17, 0 }
  0x10   : > { %s2164_s18 = smov (!%p396_p5, %s1691_s18), 1  ;;  %412 = sbr.rel (%p1446_p7) target bundleno = 34 (0x22), region = 68 }
  0x11   : > { %s399_s24 = scalar_select %p398_p6, %s1687_s17, 1 }
  0x12   : > { %s1443_s25 = sshll.u32 %s2164_s18, 1  ;;  %s1445_s26 = sshll.u32 %s2164_s18, 3  ;;  %vm413_vm0 = vcmask (!%p1446_p7), 7168   ;;  %v1705_v0 = vmov (!%p1446_p7), 0.0  }
  0x13   : > { %s401_s27 = sadd.s32 %s1443_s25, %s399_s24  ;;  %s1807_s30 = scalar_lea.vmem %s2152_s11, %s1445_s26  ;;  %414 = vst.msk [vmem:[#allocation2] sm:$0xff] (!%p1446_p7), %vm413_vm0, %v1705_v0  ;;  %415 = vst.msk [vmem:[#allocation2 + $0x8] sm:$0xff] (!%p1446_p7), %vm413_vm0, %v1705_v0 }
  0x14   : > { %s1444_s12 = sshll.u32 %s401_s27, 2  ;;  %416 = vst.msk [vmem:[#allocation2 + $0x10] sm:$0xff] (!%p1446_p7), %vm413_vm0, %v1705_v0  ;;  %417 = vst.msk [vmem:[#allocation2 + $0x18] sm:$0xff] (!%p1446_p7), %vm413_vm0, %v1705_v0 }
  0x15   : > { %s1812_s15 = scalar_lea.vmem %s2141_s0, %s1444_s12  ;;  %418 = vst.msk [vmem:[#allocation2 + $0x20] sm:$0xff] (!%p1446_p7), %vm413_vm0, %v1705_v0  ;;  %419 = vst.msk [vmem:[#allocation2 + $0x28] sm:$0xff] (!%p1446_p7), %vm413_vm0, %v1705_v0 }
  0x16   : > { %420 = vst.msk [vmem:[#allocation2 + $0x30] sm:$0xff] (!%p1446_p7), %vm413_vm0, %v1705_v0  ;;  %421 = vst.msk [vmem:[#allocation2 + $0x38] sm:$0xff] (!%p1446_p7), %vm413_vm0, %v1705_v0 }
  0x17   : > { %422 = vst.msk [vmem:[#allocation2 + $0x40] sm:$0xff] %vm413_vm0, %v1705_v0  ;;  %423 = vst.msk [vmem:[#allocation2 + $0x48] sm:$0xff] %vm413_vm0, %v1705_v0 }
  0x18   : > { %424 = vst.msk [vmem:[#allocation2 + $0x50] sm:$0xff] %vm413_vm0, %v1705_v0  ;;  %425 = vst.msk [vmem:[#allocation2 + $0x58] sm:$0xff] %vm413_vm0, %v1705_v0 }
  0x19   : > { %426 = vst.msk [vmem:[#allocation2 + $0x60] sm:$0xff] %vm413_vm0, %v1705_v0  ;;  %427 = vst.msk [vmem:[#allocation2 + $0x68] sm:$0xff] %vm413_vm0, %v1705_v0 }
  0x1a   : > { %428 = vst.msk [vmem:[#allocation2 + $0x70] sm:$0xff] %vm413_vm0, %v1705_v0  ;;  %429 = vst.msk [vmem:[#allocation2 + $0x78] sm:$0xff] %vm413_vm0, %v1705_v0 }
  0x1b   : > { %430 = vst.msk [vmem:[#allocation2 + $0x80] sm:$0xff] %vm413_vm0, %v1705_v0  ;;  %431 = vst.msk [vmem:[#allocation2 + $0x88] sm:$0xff] %vm413_vm0, %v1705_v0 }
  0x1c   : > { %432 = vst.msk [vmem:[#allocation2 + $0x90] sm:$0xff] %vm413_vm0, %v1705_v0  ;;  %433 = vst.msk [vmem:[#allocation2 + $0x98] sm:$0xff] %vm413_vm0, %v1705_v0 }
  0x1d   : > { %434 = vst.msk [vmem:[#allocation2 + $0xa0] sm:$0xff] %vm413_vm0, %v1705_v0  ;;  %435 = vst.msk [vmem:[#allocation2 + $0xa8] sm:$0xff] %vm413_vm0, %v1705_v0 }
  0x1e   : > { %436 = vst.msk [vmem:[#allocation2 + $0xb0] sm:$0xff] %vm413_vm0, %v1705_v0  ;;  %437 = vst.msk [vmem:[#allocation2 + $0xb8] sm:$0xff] %vm413_vm0, %v1705_v0 }
  0x1f   : > { %438 = vst.msk [vmem:[#allocation2 + $0xc0] sm:$0xff] %vm413_vm0, %v1705_v0  ;;  %439 = vst.msk [vmem:[#allocation2 + $0xc8] sm:$0xff] %vm413_vm0, %v1705_v0 }
  0x20   : > { %440 = vst.msk [vmem:[#allocation2 + $0xd0] sm:$0xff] %vm413_vm0, %v1705_v0  ;;  %441 = vst.msk [vmem:[#allocation2 + $0xd8] sm:$0xff] %vm413_vm0, %v1705_v0 }
  0x21   : > { %442 = vst.msk [vmem:[#allocation2 + $0xe0] sm:$0xff] %vm413_vm0, %v1705_v0  ;;  %443 = vst.msk [vmem:[#allocation2 + $0xe8] sm:$0xff] %vm413_vm0, %v1705_v0 }
  0x22 PF: > { %v445_v1 = vld [vmem:[%s2142_s1] sm:$0xff]  ;;  %v1706_v2 = vmov 1   ;;  %v1707_v3 = vmov 0   ;;  %v446_v4 = vld [vmem:[%s2142_s1 + $0x8] sm:$0xff]  ;;  %v1708_v5 = vmov 2   ;;  %v518_v9 = vld [vmem:[%s2145_s4 + $0x10] sm:$0xff]  ;;  %v457_v37 = vlaneseq }
  0x23   : > { %1642 = vset.pattern.permute.xlu1 %v1706_v2  ;;  %1641 = vset.pattern.permute.xlu0 %v1707_v3  ;;  %v495_v6 = vld [vmem:[%s2143_s2] sm:$0xff]  ;;  %v496_v7 = vld [vmem:[%s2143_s2 + $0x8] sm:$0xff]  ;;  %vm550_vm1 = vcmask 130048   ;;  %v519_v13 = vld [vmem:[%s2145_s4 + $0x18] sm:$0xff]  ;;  %vm688_vm2 = vcmask 261120   ;;  %vm1076_vm3 = vcmask 7168  }
  0x24   : > { %464 = vperm.xlu1 %1642, %v445_v1   ;;  %449 = vperm.xlu0 %1641, %v445_v1   ;;  %v516_v8 = vld [vmem:[%s2145_s4] sm:$0xff]  ;;  %v517_v10 = vld [vmem:[%s2145_s4 + $0x8] sm:$0xff]  ;;  %v622_v14 = vld [vmem:[%s2147_s6 + $0x10] sm:$0xff]  ;;  %v458_v38 = vshrl.u32 %v457_v37, 7  ;;  %vm930_vm4 = vcmask 523264   ;;  %p1475_p8 = scmp.ne.s32.totalorder %s1687_s17, 1 }
  0x25   : > { %v620_v11 = vld [vmem:[%s2147_s6] sm:$0xff]  ;;  %v621_v15 = vld [vmem:[%s2147_s6 + $0x8] sm:$0xff]  ;;  %v623_v17 = vld [vmem:[%s2147_s6 + $0x18] sm:$0xff]  ;;  %vm1286_vm5 = vcmask (!%p1475_p8), 916480   ;;  %vm1366_vm6 = vcmask (!%p1475_p8), 4096  }
  0x26   : > { %v1647_v12 = vld [vmem:[%s2144_s3] sm:$0xff]   ;;  %v626_v18 = vld [vmem:[%s2147_s6 + $0x30] sm:$0xff]  ;;  %v625_v19 = vld [vmem:[%s2147_s6 + $0x28] sm:$0xff]  ;;  %v473_v39 = vsub.s32 1, %v458_v38  ;;  %v459_v40 = vsub.s32 0, %v458_v38  ;;  %v489_v44 = vsub.s32 2, %v458_v38 }
  0x27   : > { %1503 = vmatprep.mubr.msk.bf16.mxu1 %vm550_vm1, %v1647_v12  ;;  %v624_v16 = vld [vmem:[%s2147_s6 + $0x20] sm:$0xff]  ;;  %v627_v21 = vld [vmem:[%s2147_s6 + $0x38] sm:$0xff]  ;;  %v796_v22 = vld [vmem:[%s2149_s8 + $0x10] sm:$0xff] }
  0x28   : > { %468 = vperm.xlu1 %1642, %v446_v4   ;;  %454 = vperm.xlu0 %1641, %v446_v4   ;;  %v794_v20 = vld [vmem:[%s2149_s8] sm:$0xff]  ;;  %v795_v23 = vld [vmem:[%s2149_s8 + $0x8] sm:$0xff]  ;;  %v797_v25 = vld [vmem:[%s2149_s8 + $0x18] sm:$0xff] }
  0x29   : > { %v798_v24 = vld [vmem:[%s2149_s8 + $0x20] sm:$0xff]  ;;  %v800_v26 = vld [vmem:[%s2149_s8 + $0x30] sm:$0xff]  ;;  %v799_v27 = vld [vmem:[%s2149_s8 + $0x28] sm:$0xff] }
  0x2a   : > { %v802_v28 = vld [vmem:[%s2149_s8 + $0x40] sm:$0xff]  ;;  %v801_v29 = vld [vmem:[%s2149_s8 + $0x38] sm:$0xff]  ;;  %v804_v30 = vld [vmem:[%s2149_s8 + $0x50] sm:$0xff] }
  0x2b   : > { %v803_v31 = vld [vmem:[%s2149_s8 + $0x48] sm:$0xff]  ;;  %v806_v32 = vld [vmem:[%s2149_s8 + $0x60] sm:$0xff]  ;;  %v805_v33 = vld [vmem:[%s2149_s8 + $0x58] sm:$0xff] }
  0x2c   : > { %1644 = vset.pattern.permute.xlu1 %v1708_v5  ;;  %1643 = vset.pattern.permute.xlu0 %v1708_v5  ;;  %v808_v34 = vld [vmem:[%s2149_s8 + $0x70] sm:$0xff]  ;;  %v807_v35 = vld [vmem:[%s2149_s8 + $0x68] sm:$0xff]  ;;  %v809_v36 = vld [vmem:[%s2149_s8 + $0x78] sm:$0xff] }
  0x2d   : > { %484 = vperm.xlu1 %1644, %v446_v4   ;;  %480 = vperm.xlu0 %1643, %v445_v1   ;;  %v444_v41 = vld [vmem:[%s1812_s15] sm:$0x7]  ;;  %v1648_v5 = vld [vmem:[%s2144_s3 + $0x8] sm:$0xff]  }
  0x2e   : > { %v474_v45 = vrot.slane %v444_v41, %v473_v39  ;;  %v460_v46 = vrot.slane %v444_v41, %v459_v40  ;;  %v490_v49 = vrot.slane %v444_v41, %v489_v44 }
  0x31   : > { %1645 = vset.pattern.permute.xlu1 %v1707_v3  ;;  %1646 = vset.pattern.permute.xlu0 %v1707_v3 }
  0x32   : > { %499 = vperm.xlu1 %1645, %v495_v6   ;;  %504 = vperm.xlu0 %1646, %v496_v7  }
  0x36   : > { %522 = vperm.xlu1 %1645, %v516_v8   ;;  %532 = vperm.xlu0 %1646, %v518_v9  }
  0x3a   : > { %527 = vperm.xlu1 %1645, %v517_v10   ;;  %630 = vperm.xlu0 %1646, %v620_v11  }
  0x3e   : > { %537 = vperm.xlu1 %1645, %v519_v13   ;;  %640 = vperm.xlu0 %1646, %v622_v14  }
  0x42   : > { %635 = vperm.xlu1 %1645, %v621_v15   ;;  %650 = vperm.xlu0 %1646, %v624_v16  }
  0x46   : > { %645 = vperm.xlu1 %1645, %v623_v17   ;;  %660 = vperm.xlu0 %1646, %v626_v18  }
  0x4a   : > { %655 = vperm.xlu1 %1645, %v625_v19   ;;  %812 = vperm.xlu0 %1646, %v794_v20  }
  0x4e   : > { %665 = vperm.xlu1 %1645, %v627_v21   ;;  %822 = vperm.xlu0 %1646, %v796_v22   ;;  %v1649_v22 = vld [vmem:[%s2146_s5] sm:$0xff]  }
  0x52   : > { %817 = vperm.xlu1 %1645, %v795_v23   ;;  %832 = vperm.xlu0 %1646, %v798_v24  }
  0x56   : > { %827 = vperm.xlu1 %1645, %v797_v25   ;;  %842 = vperm.xlu0 %1646, %v800_v26  }
  0x5a   : > { %837 = vperm.xlu1 %1645, %v799_v27   ;;  %852 = vperm.xlu0 %1646, %v802_v28  }
  0x5e   : > { %847 = vperm.xlu1 %1645, %v801_v29   ;;  %862 = vperm.xlu0 %1646, %v804_v30  }
  0x62   : > { %857 = vperm.xlu1 %1645, %v803_v31   ;;  %872 = vperm.xlu0 %1646, %v806_v32  }
  0x66   : > { %867 = vperm.xlu1 %1645, %v805_v33   ;;  %882 = vperm.xlu0 %1646, %v808_v34  }
  0x6a   : > { %877 = vperm.xlu1 %1645, %v807_v35   ;;  %v1069_v35 = vld [vmem:[#allocation2 + $0x8] sm:$0xff] }
  0x6e   : > { %887 = vperm.xlu1 %1645, %v809_v36   ;;  %v1068_v36 = vld [vmem:[#allocation2] sm:$0xff] }
  0xa3   : > { %v465_v42 = vpop.permute.xlu1 %464  ;;  %v450_v43 = vpop.permute.xlu0 %449 }
  0xa4   : > { %v475_v50 = vmul.f32 %v474_v45, %v465_v42  ;;  %v461_v51 = vmul.f32 %v460_v46, %v450_v43 }
  0xa6   : > { %v477_v56 = vadd.f32 %v475_v50, %v461_v51 }
  0xa7   : > { %v469_v47 = vpop.permute.xlu1 %468  ;;  %v455_v48 = vpop.permute.xlu0 %454 }
  0xa8   : > { %v476_v52 = vmul.f32 %v474_v45, %v469_v47  ;;  %v462_v53 = vmul.f32 %v460_v46, %v455_v48 }
  0xaa   : > { %v478_v57 = vadd.f32 %v476_v52, %v462_v53 }
  0xac   : > { %v485_v54 = vpop.permute.xlu1 %484  ;;  %v481_v55 = vpop.permute.xlu0 %480 }
  0xad   : > { %v492_v58 = vmul.f32 %v490_v49, %v485_v54  ;;  %v491_v59 = vmul.f32 %v490_v49, %v481_v55  ;;  %v1650_v55 = vld [vmem:[%s2146_s5 + $0x8] sm:$0xff]  }
  0xaf   : > { %v493_v60 = vadd.f32 %v491_v59, %v477_v56  ;;  %v494_v61 = vadd.f32 %v492_v58, %v478_v57  ;;  %v1651_v56 = vld [vmem:[%s2146_s5 + $0x10] sm:$0xff]   ;;  %v1652_v57 = vld [vmem:[%s2146_s5 + $0x18] sm:$0xff]   ;;  %v1653_v58 = vld [vmem:[%s2148_s7] sm:$0xff]  }
  0xb0   : > { %v1654_v59 = vld [vmem:[%s2148_s7 + $0x30] sm:$0xff]   ;;  %1527 = vmatprep.mubr.msk.bf16.mxu0 %vm930_vm4, %v1653_v58  ;;  %v1101_v58 = vld [vmem:[#allocation2 + $0x40] sm:$0xff] }
  0xb1   : > { %v500_v62 = vpop.permute.xlu1 %499  ;;  %v505_v63 = vpop.permute.xlu0 %504 }
  0xb2   : > { %v507_v0 = vadd.f32 %v500_v62, %v493_v60  ;;  %v508_v1 = vadd.f32 %v505_v63, %v494_v61  ;;  %v1081_v60 = vld [vmem:[#allocation2 + $0x20] sm:$0xff]  ;;  %v1079_v61 = vld [vmem:[#allocation2 + $0x10] sm:$0xff] }
  0xb4   : > { %v509_v2 = vmax.f32 %v507_v0, 0.0  ;;  %v510_v3 = vmax.f32 %v508_v1, 0.0 }
  0xb5   : > { %v523_v6 = vpop.permute.xlu1 %522  ;;  %v533_v8 = vpop.permute.xlu0 %532 }
  0xb6   : > { %1072 = vadd.xlane.f32.xlu1 %v510_v3  ;;  %1070 = vadd.xlane.f32.xlu0 %v509_v2  ;;  %v515_v4 = vpack.c.bf16 %v510_v3, %v509_v2  ;;  %v1082_v2 = vld [vmem:[#allocation2 + $0x28] sm:$0xff] }
  0xb8   : > { %1501 = vmatprep.subr.bf16.mxu1 %v515_v4 }
  0xb9   : > { %1502 = vmatpush3.bf16.msra.mxu1 %v515_v4  ;;  %v528_v7 = vpop.permute.xlu1 %527  ;;  %v1950_v10 = vpop.permute.xlu0 %630 }
  0xbc   : > { %1504 = vmatmul.mubr.msk.bf16.vlgmr.msra.gmra.mrb[0].mxu1 %vm550_vm1, %v1648_v5  ;;  %v1080_v5 = vld [vmem:[#allocation2 + $0x18] sm:$0xff] }
  0xbd   : > { %v538_v9 = vpop.permute.xlu1 %537  ;;  %v1954_v12 = vpop.permute.xlu0 %640  ;;  %1511 = vmatprep.mubr.msk.bf16.mxu1 %vm688_vm2, %v1649_v22 }
  0xc1   : > { %v1952_v11 = vpop.permute.xlu1 %635  ;;  %v1958_v14 = vpop.permute.xlu0 %650 }
  0xc5   : > { %v1956_v13 = vpop.permute.xlu1 %645  ;;  %v1962_v16 = vpop.permute.xlu0 %660 }
  0xc9   : > { %v1960_v15 = vpop.permute.xlu1 %655  ;;  %v1966_v18 = vpop.permute.xlu0 %812 }
  0xcd   : > { %v1964_v17 = vpop.permute.xlu1 %665  ;;  %v1970_v20 = vpop.permute.xlu0 %822 }
  0xd1   : > { %v1968_v19 = vpop.permute.xlu1 %817  ;;  %v1978_v23 = vpop.permute.xlu0 %832 }
  0xd5   : > { %v1972_v21 = vpop.permute.xlu1 %827  ;;  %v1982_v25 = vpop.permute.xlu0 %842 }
  0xd9   : > { %v1980_v24 = vpop.permute.xlu1 %837  ;;  %v1986_v27 = vpop.permute.xlu0 %852 }
  0xdd   : > { %v1984_v26 = vpop.permute.xlu1 %847  ;;  %v1990_v29 = vpop.permute.xlu0 %862 }
  0xe1   : > { %v1988_v28 = vpop.permute.xlu1 %857  ;;  %v1994_v31 = vpop.permute.xlu0 %872 }
  0xe5   : > { %v1992_v30 = vpop.permute.xlu1 %867  ;;  %v1998_v33 = vpop.permute.xlu0 %882 }
  0xe9   : > { %v1996_v32 = vpop.permute.xlu1 %877 }
  0xed   : > { %v2000_v34 = vpop.permute.xlu1 %887 }
 0x143   : > { %v1073_v37 = vpop.xlane.xlu1 %1072  ;;  %v1071_v38 = vpop.xlane.xlu0 %1070 }
 0x144   : > { %v1075_v39 = vadd.f32 %v1073_v37, %v1069_v35  ;;  %v1074_v40 = vadd.f32 %v1071_v38, %v1068_v36 }
 0x146   : > { %1078 = vst.msk [vmem:[#allocation2 + $0x8] sm:$0xff] %vm1076_vm3, %v1075_v39  ;;  %1077 = vst.msk [vmem:[#allocation2] sm:$0xff] %vm1076_vm3, %v1074_v40 }
 0x18f   : > { %v1505_v41 = vpop.f32.mrb[0].mxu1 }
 0x190   : > { %v600_v42 = vadd.f32 %v1505_v41, %v533_v8  ;;  %v591_v43 = vpop.f32.mrb[1].mxu1 }
 0x191   : > { %v592_v44 = vadd.f32 %v591_v43, %v523_v6  ;;  %v1506_v45 = vpop.f32.mrb[2].mxu1 }
 0x192   : > { %v608_v46 = vmax.f32 %v600_v42, 0.0  ;;  %v603_v47 = vadd.f32 %v1506_v45, %v538_v9  ;;  %v594_v48 = vpop.f32.mrb[3].mxu1 }
 0x193   : > { %v606_v49 = vmax.f32 %v592_v44, 0.0  ;;  %v595_v50 = vadd.f32 %v594_v48, %v528_v7 }
 0x194   : > { %v609_v51 = vmax.f32 %v603_v47, 0.0  ;;  %1087 = vadd.xlane.f32.xlu1 %v608_v46 }
 0x195   : > { %v607_v52 = vmax.f32 %v595_v50, 0.0  ;;  %1083 = vadd.xlane.f32.xlu0 %v606_v49 }
 0x196   : > { %v619_v53 = vpack.c.bf16 %v609_v51, %v608_v46 }
 0x197   : > { %v618_v54 = vpack.c.bf16 %v607_v52, %v606_v49 }
 0x199   : > { %1089 = vadd.xlane.f32.xlu0 %v609_v51  ;;  %1507 = vmatprep.subr.bf16.mxu1 %v618_v54 }
 0x19a   : > { %1508 = vmatpush3.bf16.msra.mxu1 %v618_v54  ;;  %v1657_v54 = vld [vmem:[%s2148_s7 + $0x10] sm:$0xff]  }
 0x19b   : > { %1509 = vmatprep.subr.bf16.mxu1 %v619_v53 }
 0x19d   : > { %1085 = vadd.xlane.f32.xlu0 %v607_v52 }
 0x19e   : > { %1510 = vmatpush3.bf16.msra.mxu1 %v619_v53 }
 0x1a1   : > { %1512 = vmatmul.mubr.msk.bf16.vlgmr.msra.gmra.mrb[4].mxu1 %vm688_vm2, %v1650_v55  ;;  %v1658_v55 = vld [vmem:[%s2148_s7 + $0x18] sm:$0xff]  }
 0x1a2   : > { %1515 = vmatprep.mubr.msk.bf16.mxu1 %vm688_vm2, %v1651_v56  ;;  %v1659_v56 = vld [vmem:[%s2148_s7 + $0x20] sm:$0xff]  }
 0x1a9   : > { %1516 = vmatmul.mubr.msk.bf16.gmra.mrb[8].mxu1 %vm688_vm2, %v1652_v57  ;;  %v1660_v57 = vld [vmem:[%s2148_s7 + $0x28] sm:$0xff]  }
 0x1aa   : > { %1539 = vmatprep.mubr.msk.bf16.mxu1 %vm930_vm4, %v1654_v59 }
 0x221   : > { %v1088_v62 = vpop.xlane.xlu1 %1087 }
 0x222   : > { %v1093_v63 = vadd.f32 %v1088_v62, %v1081_v60  ;;  %v1084_v0 = vpop.xlane.xlu0 %1083  ;;  %v1102_v60 = vld [vmem:[#allocation2 + $0x48] sm:$0xff] }
 0x223   : > { %v1091_v1 = vadd.f32 %v1084_v0, %v1079_v61 }
 0x224   : > { %1097 = vst.msk [vmem:[#allocation2 + $0x20] sm:$0xff] %vm1076_vm3, %v1093_v63  ;;  %v1099_v63 = vld [vmem:[#allocation2 + $0x30] sm:$0xff] }
 0x225   : > { %1095 = vst.msk [vmem:[#allocation2 + $0x10] sm:$0xff] %vm1076_vm3, %v1091_v1 }
 0x226   : > { %v1090_v3 = vpop.xlane.xlu0 %1089 }
 0x227   : > { %v1094_v4 = vadd.f32 %v1090_v3, %v1082_v2  ;;  %v1100_v2 = vld [vmem:[#allocation2 + $0x38] sm:$0xff] }
 0x229   : > { %1098 = vst.msk [vmem:[#allocation2 + $0x28] sm:$0xff] %vm1076_vm3, %v1094_v4 }
 0x22a   : > { %v1086_v6 = vpop.xlane.xlu0 %1085 }
 0x22b   : > { %v1092_v7 = vadd.f32 %v1086_v6, %v1080_v5  ;;  %v1105_v5 = vld [vmem:[#allocation2 + $0x60] sm:$0xff] }
 0x22d   : > { %1096 = vst.msk [vmem:[#allocation2 + $0x18] sm:$0xff] %vm1076_vm3, %v1092_v7 }
 0x274   : > { %v1513_v8 = vpop.f32.mrb[4].mxu1 }
 0x275   : > { %v744_v9 = vadd.f32 %v1513_v8, %v1954_v12  ;;  %v735_v22 = vpop.f32.mrb[5].mxu1  ;;  %v1106_v8 = vld [vmem:[#allocation2 + $0x68] sm:$0xff] }
 0x276   : > { %v736_v35 = vadd.f32 %v735_v22, %v1950_v10  ;;  %v1514_v36 = vpop.f32.mrb[6].mxu1 }
 0x277   : > { %v768_v37 = vmax.f32 %v744_v9, 0.0  ;;  %v747_v38 = vadd.f32 %v1514_v36, %v1956_v13  ;;  %v738_v39 = vpop.f32.mrb[7].mxu1 }
 0x278   : > { %v739_v40 = vadd.f32 %v738_v39, %v1952_v11  ;;  %v766_v42 = vmax.f32 %v736_v35, 0.0  ;;  %v1103_v35 = vld [vmem:[#allocation2 + $0x50] sm:$0xff] }
 0x279   : > { %v769_v41 = vmax.f32 %v747_v38, 0.0  ;;  %1111 = vadd.xlane.f32.xlu1 %v768_v37  ;;  %v1104_v38 = vld [vmem:[#allocation2 + $0x58] sm:$0xff] }
 0x27a   : > { %v767_v43 = vmax.f32 %v739_v40, 0.0 }
 0x27b   : > { %v791_v44 = vpack.c.bf16 %v769_v41, %v768_v37  ;;  %1113 = vadd.xlane.f32.xlu0 %v769_v41 }
 0x27c   : > { %v790_v45 = vpack.c.bf16 %v767_v43, %v766_v42  ;;  %v1517_v46 = vpop.f32.mrb[8].mxu1 }
 0x27d   : > { %v760_v12 = vadd.f32 %v1517_v46, %v1962_v16  ;;  %v751_v47 = vpop.f32.mrb[9].mxu1  ;;  %1107 = vadd.xlane.f32.xlu1 %v766_v42 }
 0x27e   : > { %v752_v10 = vadd.f32 %v751_v47, %v1958_v14  ;;  %v1518_v48 = vpop.f32.mrb[10].mxu1  ;;  %1519 = vmatprep.subr.bf16.mxu0 %v790_v45  ;;  %1588 = vmatprep.subr.bf16.mxu1 %v790_v45 }
 0x27f   : > { %v772_v13 = vmax.f32 %v760_v12, 0.0  ;;  %v763_v11 = vadd.f32 %v1518_v48, %v1964_v17  ;;  %v754_v49 = vpop.f32.mrb[11].mxu1  ;;  %1109 = vadd.xlane.f32.xlu0 %v767_v43  ;;  %1520 = vmatpush3.bf16.msra.mxu0 %v790_v45  ;;  %v1656_v17 = vld [vmem:[%s2148_s7 + $0x38] sm:$0xff]  }
 0x280   : > { %v755_v50 = vadd.f32 %v754_v49, %v1960_v15  ;;  %1592 = vmatpush3.bf16.msra.mxu1 %v790_v45  ;;  %1521 = vmatprep.subr.bf16.mxu0 %v791_v44  ;;  %v770_v16 = vmax.f32 %v752_v10, 0.0  ;;  %v1655_v15 = vld [vmem:[%s2148_s7 + $0x8] sm:$0xff]  }
 0x281   : > { %v773_v51 = vmax.f32 %v763_v11, 0.0  ;;  %1589 = vmatprep.subr.bf16.mxu1 %v791_v44  ;;  %1119 = vadd.xlane.f32.xlu1 %v772_v13 }
 0x282   : > { %v771_v52 = vmax.f32 %v755_v50, 0.0 }
 0x283   : > { %v793_v53 = vpack.c.bf16 %v773_v51, %v772_v13  ;;  %1121 = vadd.xlane.f32.xlu0 %v773_v51  ;;  %1522 = vmatpush3.bf16.msra.mxu0 %v791_v44 }
 0x284   : > { %v792_v14 = vpack.c.bf16 %v771_v52, %v770_v16  ;;  %1593 = vmatpush3.bf16.msra.mxu1 %v791_v44 }
 0x285   : > { %1115 = vadd.xlane.f32.xlu1 %v770_v16 }
 0x286   : > { %1523 = vmatprep.subr.bf16.mxu0 %v792_v14  ;;  %1590 = vmatprep.subr.bf16.mxu1 %v792_v14 }
 0x287   : > { %1117 = vadd.xlane.f32.xlu0 %v771_v52  ;;  %1524 = vmatpush3.bf16.msra.mxu0 %v792_v14 }
 0x288   : > { %1594 = vmatpush3.bf16.msra.mxu1 %v792_v14  ;;  %1525 = vmatprep.subr.bf16.mxu0 %v793_v53 }
 0x289   : > { %1591 = vmatprep.subr.bf16.mxu1 %v793_v53 }
 0x28b   : > { %1526 = vmatpush3.bf16.msra.mxu0 %v793_v53 }
 0x28c   : > { %1595 = vmatpush3.bf16.msra.mxu1 %v793_v53 }
 0x28e   : > { %1528 = vmatmul.mubr.msk.bf16.vlgmr.msra.gmra.mrb[0].mxu0 %vm930_vm4, %v1655_v15 }
 0x28f   : > { %1540 = vmatmul.mubr.msk.bf16.vlgmr.msra.gmra.mrb[12].mxu1 %vm930_vm4, %v1656_v17  ;;  %1531 = vmatprep.mubr.msk.bf16.mxu0 %vm930_vm4, %v1657_v54 }
 0x296   : > { %1532 = vmatmul.mubr.msk.bf16.gmra.mrb[4].mxu0 %vm930_vm4, %v1658_v55 }
 0x297   : > { %1535 = vmatprep.mubr.msk.bf16.mxu0 %vm930_vm4, %v1659_v56 }
 0x29e   : > { %1536 = vmatmul.mubr.msk.bf16.gmra.mrb[8].mxu0 %vm930_vm4, %v1660_v57 }
 0x306   : > { %v1112_v59 = vpop.xlane.xlu1 %1111 }
 0x307   : > { %v1125_v61 = vadd.f32 %v1112_v59, %v1101_v58 }
 0x308   : > { %v1114_v62 = vpop.xlane.xlu0 %1113 }
 0x309   : > { %1133 = vst.msk [vmem:[#allocation2 + $0x40] sm:$0xff] %vm1076_vm3, %v1125_v61  ;;  %v1126_v0 = vadd.f32 %v1114_v62, %v1102_v60 }
 0x30a   : > { %v1108_v1 = vpop.xlane.xlu1 %1107 }
 0x30b   : > { %1134 = vst.msk [vmem:[#allocation2 + $0x48] sm:$0xff] %vm1076_vm3, %v1126_v0  ;;  %v1123_v3 = vadd.f32 %v1108_v1, %v1099_v63 }
 0x30c   : > { %v1110_v4 = vpop.xlane.xlu0 %1109 }
 0x30d   : > { %1131 = vst.msk [vmem:[#allocation2 + $0x30] sm:$0xff] %vm1076_vm3, %v1123_v3  ;;  %v1124_v6 = vadd.f32 %v1110_v4, %v1100_v2 }
 0x30e   : > { %v1120_v7 = vpop.xlane.xlu1 %1119 }
 0x30f   : > { %1132 = vst.msk [vmem:[#allocation2 + $0x38] sm:$0xff] %vm1076_vm3, %v1124_v6  ;;  %v1129_v9 = vadd.f32 %v1120_v7, %v1105_v5  ;;  %v1141_v6 = vld [vmem:[#allocation2 + $0x80] sm:$0xff]  ;;  %v1142_v7 = vld [vmem:[#allocation2 + $0x88] sm:$0xff] }
 0x310   : > { %v1122_v22 = vpop.xlane.xlu0 %1121 }
 0x311   : > { %1137 = vst.msk [vmem:[#allocation2 + $0x60] sm:$0xff] %vm1076_vm3, %v1129_v9  ;;  %v1130_v36 = vadd.f32 %v1122_v22, %v1106_v8 }
 0x312   : > { %v1116_v37 = vpop.xlane.xlu1 %1115 }
 0x313   : > { %1138 = vst.msk [vmem:[#allocation2 + $0x68] sm:$0xff] %vm1076_vm3, %v1130_v36  ;;  %v1127_v39 = vadd.f32 %v1116_v37, %v1103_v35  ;;  %v1140_v35 = vld [vmem:[#allocation2 + $0x78] sm:$0xff]  ;;  %v1151_v37 = vld [vmem:[#allocation2 + $0xd0] sm:$0xff] }
 0x314   : > { %v1118_v40 = vpop.xlane.xlu0 %1117 }
 0x315   : > { %1135 = vst.msk [vmem:[#allocation2 + $0x50] sm:$0xff] %vm1076_vm3, %v1127_v39  ;;  %v1128_v41 = vadd.f32 %v1118_v40, %v1104_v38  ;;  %v1152_v40 = vld [vmem:[#allocation2 + $0xd8] sm:$0xff] }
 0x317   : > { %1136 = vst.msk [vmem:[#allocation2 + $0x58] sm:$0xff] %vm1076_vm3, %v1128_v41 }
 0x361   : > { %v1529_v42 = vpop.f32.mrb[0].mxu0 }
 0x362   : > { %v998_v43 = vadd.f32 %v1529_v42, %v1970_v20  ;;  %v1541_v44 = vpop.f32.mrb[12].mxu1  ;;  %v989_v45 = vpop.f32.mrb[1].mxu0 }
 0x363   : > { %v1037_v46 = vpop.f32.mrb[13].mxu1  ;;  %v1530_v12 = vpop.f32.mrb[2].mxu0  ;;  %v990_v10 = vadd.f32 %v989_v45, %v1966_v18 }
 0x364   : > { %v1054_v47 = vmax.f32 %v998_v43, 0.0  ;;  %v1001_v48 = vadd.f32 %v1530_v12, %v1972_v21  ;;  %v1542_v13 = vpop.f32.mrb[14].mxu1  ;;  %v992_v11 = vpop.f32.mrb[3].mxu0  ;;  %v1038_v52 = vadd.f32 %v1037_v46, %v1994_v31  ;;  %v1145_v43 = vld [vmem:[#allocation2 + $0xa0] sm:$0xff]  ;;  %v1146_v46 = vld [vmem:[#allocation2 + $0xa8] sm:$0xff] }
 0x365   : > { %v1040_v49 = vpop.f32.mrb[15].mxu1  ;;  %v993_v51 = vadd.f32 %v992_v11, %v1968_v19  ;;  %v1052_v16 = vmax.f32 %v990_v10, 0.0  ;;  %v1143_v10 = vld [vmem:[#allocation2 + $0x90] sm:$0xff]  ;;  %v1144_v11 = vld [vmem:[#allocation2 + $0x98] sm:$0xff] }
 0x366   : > { %v1055_v50 = vmax.f32 %v1001_v48, 0.0  ;;  %1159 = vadd.xlane.f32.xlu1 %v1054_v47  ;;  %v1041_v14 = vadd.f32 %v1040_v49, %v1996_v32  ;;  %v1064_v17 = vmax.f32 %v1038_v52, 0.0 }
 0x367   : > { %v1053_v53 = vmax.f32 %v993_v51, 0.0  ;;  %v1149_v51 = vld [vmem:[#allocation2 + $0xc0] sm:$0xff] }
 0x368   : > { %1161 = vadd.xlane.f32.xlu0 %v1055_v50  ;;  %v1065_v55 = vmax.f32 %v1041_v14, 0.0 }
 0x369   : > { %v1533_v20 = vpop.f32.mrb[4].mxu0 }
 0x36a   : > { %v1005_v15 = vpop.f32.mrb[5].mxu0  ;;  %1155 = vadd.xlane.f32.xlu1 %v1052_v16  ;;  %v1014_v21 = vadd.f32 %v1533_v20, %v1982_v25  ;;  %v1150_v20 = vld [vmem:[#allocation2 + $0xc8] sm:$0xff] }
 0x36b   : > { %v1534_v18 = vpop.f32.mrb[6].mxu0  ;;  %v1006_v31 = vadd.f32 %v1005_v15, %v1978_v23  ;;  %v1147_v15 = vld [vmem:[#allocation2 + $0xb0] sm:$0xff] }
 0x36c   : > { %v1008_v54 = vpop.f32.mrb[7].mxu0  ;;  %1157 = vadd.xlane.f32.xlu0 %v1053_v53  ;;  %v1017_v19 = vadd.f32 %v1534_v18, %v1984_v26  ;;  %v1058_v56 = vmax.f32 %v1014_v21, 0.0  ;;  %v1148_v21 = vld [vmem:[#allocation2 + $0xb8] sm:$0xff] }
 0x36d   : > { %v1009_v32 = vadd.f32 %v1008_v54, %v1980_v24  ;;  %v1056_v61 = vmax.f32 %v1006_v31, 0.0  ;;  %v1046_v24 = vadd.f32 %v1541_v44, %v1998_v33 }
 0x36e   : > { %1179 = vadd.xlane.f32.xlu1 %v1064_v17  ;;  %v1059_v58 = vmax.f32 %v1017_v19, 0.0  ;;  %v1153_v19 = vld [vmem:[#allocation2 + $0xe0] sm:$0xff] }
 0x36f   : > { %v1057_v63 = vmax.f32 %v1009_v32, 0.0  ;;  %v1066_v5 = vmax.f32 %v1046_v24, 0.0  ;;  %v1228_v24 = vld [vmem:[#allocation2 + $0x28] sm:$0xff] (!%p1475_p8) }
 0x370   : > { %1181 = vadd.xlane.f32.xlu0 %v1065_v55 }
 0x371   : > { %v1537_v57 = vpop.f32.mrb[8].mxu0 }
 0x372   : > { %v1021_v59 = vpop.f32.mrb[9].mxu0  ;;  %1167 = vadd.xlane.f32.xlu1 %v1058_v56  ;;  %v1030_v25 = vadd.f32 %v1537_v57, %v1990_v29  ;;  %v1049_v29 = vadd.f32 %v1542_v13, %v2000_v34  ;;  %v1154_v57 = vld [vmem:[#allocation2 + $0xe8] sm:$0xff] }
 0x373   : > { %v1538_v60 = vpop.f32.mrb[10].mxu0  ;;  %v1022_v23 = vadd.f32 %v1021_v59, %v1986_v27 }
 0x374   : > { %v1024_v62 = vpop.f32.mrb[11].mxu0  ;;  %1169 = vadd.xlane.f32.xlu0 %v1059_v58  ;;  %v1033_v26 = vadd.f32 %v1538_v60, %v1992_v30  ;;  %v1062_v0 = vmax.f32 %v1030_v25, 0.0  ;;  %v1067_v30 = vmax.f32 %v1049_v29, 0.0  ;;  %v1223_v60 = vld [vmem:[#allocation2] sm:$0xff] (!%p1475_p8)  ;;  %v1225_v25 = vld [vmem:[#allocation2 + $0x10] sm:$0xff] (!%p1475_p8) }
 0x375   : > { %v1025_v2 = vadd.f32 %v1024_v62, %v1988_v28  ;;  %v1060_v3 = vmax.f32 %v1022_v23, 0.0  ;;  %v1139_v28 = vld [vmem:[#allocation2 + $0x70] sm:$0xff]  ;;  %v1709_v62 = vmov (!%p1475_p8), 0.0|0.0   ;;  %v1255_v23 = vmul.f32 (!%p1475_p8), 0.00390625, %v1225_v25 }
 0x376   : > { %1163 = vadd.xlane.f32.xlu1 %v1056_v61  ;;  %v1063_v1 = vmax.f32 %v1033_v26, 0.0  ;;  %v1224_v61 = vld [vmem:[#allocation2 + $0x8] sm:$0xff] (!%p1475_p8)  ;;  %1543 = vmatprep.subr.bf16.mxu0 (!%p1475_p8), %v1709_v62 }
 0x377   : > { %v1061_v4 = vmax.f32 %v1025_v2, 0.0  ;;  %v1254_v26 = vmul.f32 (!%p1475_p8), 0.00390625, %v1224_v61  ;;  %v1227_v2 = vld [vmem:[#allocation2 + $0x20] sm:$0xff] (!%p1475_p8) }
 0x378   : > { %1165 = vadd.xlane.f32.xlu0 %v1057_v63  ;;  %v1253_v63 = vmul.f32 (!%p1475_p8), 0.00390625, %v1223_v60 }
 0x37a   : > { %1175 = vadd.xlane.f32.xlu1 %v1062_v0  ;;  %v1226_v0 = vld [vmem:[#allocation2 + $0x18] sm:$0xff] (!%p1475_p8) }
 0x37c   : > { %1177 = vadd.xlane.f32.xlu0 %v1063_v1  ;;  %v1256_v1 = vmul.f32 (!%p1475_p8), 0.00390625, %v1226_v0 }
 0x37e   : > { %1171 = vadd.xlane.f32.xlu1 %v1060_v3  ;;  %v1544_v3 = vpack.c.bf16 (!%p1475_p8), %v1254_v26, %v1253_v63  ;;  %v1547_v29 = vpack.c.bf16 (!%p1475_p8), %v1256_v1, %v1255_v23 }
 0x380   : > { %1173 = vadd.xlane.f32.xlu0 %v1061_v4  ;;  %1545 = vmatpush1.bf16.msra.mxu0 (!%p1475_p8), %v1544_v3  ;;  %v1257_v4 = vmul.f32 (!%p1475_p8), 0.00390625, %v1227_v2 }
 0x381   : > { %1546 = vmatprep.subr.bf16.mxu0 (!%p1475_p8), %v1709_v62 }
 0x382   : > { %1183 = vadd.xlane.f32.xlu1 %v1066_v5  ;;  %v1258_v5 = vmul.f32 (!%p1475_p8), 0.00390625, %v1228_v24 }
 0x384   : > { %1185 = vadd.xlane.f32.xlu0 %v1067_v30  ;;  %v1229_v30 = vld [vmem:[#allocation2 + $0x30] sm:$0xff] (!%p1475_p8)  ;;  %1548 = vmatpush1.bf16.msra.mxu0 (!%p1475_p8), %v1547_v29 }
 0x385   : > { %1549 = vmatprep.subr.bf16.mxu0 (!%p1475_p8), %v1709_v62 }
 0x3f3   : > { %v1160_v27 = vpop.xlane.xlu1 %1159 }
 0x3f4   : > { %v1189_v8 = vadd.f32 %v1160_v27, %v1141_v6  ;;  %v1230_v6 = vld [vmem:[#allocation2 + $0x38] sm:$0xff] (!%p1475_p8)  ;;  %v1550_v27 = vpack.c.bf16 (!%p1475_p8), %v1258_v5, %v1257_v4  ;;  %v1283_v5 = vld [vmem:[%s2150_s9] sm:$0x1f] (!%p1475_p8) }
 0x3f5   : > { %v1162_v9 = vpop.xlane.xlu0 %1161 }
 0x3f6   : > { %1205 = vst.msk [vmem:[#allocation2 + $0x80] sm:$0xff] %vm1076_vm3, %v1189_v8  ;;  %v1190_v33 = vadd.f32 %v1162_v9, %v1142_v7  ;;  %v1259_v7 = vmul.f32 (!%p1475_p8), 0.00390625, %v1229_v30  ;;  %v1260_v8 = vmul.f32 (!%p1475_p8), 0.00390625, %v1230_v6  ;;  %v1231_v9 = vld [vmem:[#allocation2 + $0x40] sm:$0xff] (!%p1475_p8)  ;;  %1551 = vmatpush1.bf16.msra.mxu0 (!%p1475_p8), %v1550_v27 }
 0x3f7   : > { %v1156_v22 = vpop.xlane.xlu1 %1155  ;;  %1552 = vmatprep.subr.bf16.mxu0 (!%p1475_p8), %v1709_v62  ;;  %v1285_v30 = vld [vmem:[%s2151_s10] sm:$0x1f] (!%p1475_p8) }
 0x3f8   : > { %1206 = vst.msk [vmem:[#allocation2 + $0x88] sm:$0xff] %vm1076_vm3, %v1190_v33  ;;  %v1187_v34 = vadd.f32 %v1156_v22, %v1139_v28  ;;  %v1232_v28 = vld [vmem:[#allocation2 + $0x48] sm:$0xff] (!%p1475_p8)  ;;  %v1553_v22 = vpack.c.bf16 (!%p1475_p8), %v1260_v8, %v1259_v7 }
 0x3f9   : > { %v1158_v36 = vpop.xlane.xlu0 %1157  ;;  %v1284_v33 = vld [vmem:[%s2150_s9 + $0x8] sm:$0x1f] (!%p1475_p8) }
 0x3fa   : > { %1203 = vst.msk [vmem:[#allocation2 + $0x70] sm:$0xff] %vm1076_vm3, %v1187_v34  ;;  %v1188_v38 = vadd.f32 %v1158_v36, %v1140_v35  ;;  %1476 = vmatprep.mubr.msk.f32.mxu0 (!%p1475_p8), %vm1286_vm5, %v1284_v33  ;;  %v1261_v35 = vmul.f32 (!%p1475_p8), 0.00390625, %v1231_v9  ;;  %v1262_v34 = vmul.f32 (!%p1475_p8), 0.00390625, %v1232_v28  ;;  %v1233_v36 = vld [vmem:[#allocation2 + $0x50] sm:$0xff] (!%p1475_p8)  ;;  %1554 = vmatpush1.bf16.msra.mxu0 (!%p1475_p8), %v1553_v22 }
 0x3fb   : > { %v1180_v39 = vpop.xlane.xlu1 %1179  ;;  %1555 = vmatprep.subr.bf16.mxu0 (!%p1475_p8), %v1709_v62 }
 0x3fc   : > { %1204 = vst.msk [vmem:[#allocation2 + $0x78] sm:$0xff] %vm1076_vm3, %v1188_v38  ;;  %v1199_v41 = vadd.f32 %v1180_v39, %v1151_v37  ;;  %v1234_v37 = vld [vmem:[#allocation2 + $0x58] sm:$0xff] (!%p1475_p8)  ;;  %v1556_v38 = vpack.c.bf16 (!%p1475_p8), %v1262_v34, %v1261_v35  ;;  %v1263_v39 = vmul.f32 (!%p1475_p8), 0.00390625, %v1233_v36 }
 0x3fd   : > { %v1182_v42 = vpop.xlane.xlu0 %1181 }
 0x3fe   : > { %1215 = vst.msk [vmem:[#allocation2 + $0xd0] sm:$0xff] %vm1076_vm3, %v1199_v41  ;;  %v1200_v44 = vadd.f32 %v1182_v42, %v1152_v40  ;;  %v1264_v40 = vmul.f32 (!%p1475_p8), 0.00390625, %v1234_v37  ;;  %v1235_v41 = vld [vmem:[#allocation2 + $0x60] sm:$0xff] (!%p1475_p8)  ;;  %v1236_v42 = vld [vmem:[#allocation2 + $0x68] sm:$0xff] (!%p1475_p8)  ;;  %1557 = vmatpush1.bf16.msra.mxu0 (!%p1475_p8), %v1556_v38 }
 0x3ff   : > { %v1168_v45 = vpop.xlane.xlu1 %1167  ;;  %1558 = vmatprep.subr.bf16.mxu0 (!%p1475_p8), %v1709_v62 }
 0x400   : > { %1216 = vst.msk [vmem:[#allocation2 + $0xd8] sm:$0xff] %vm1076_vm3, %v1200_v44  ;;  %v1193_v12 = vadd.f32 %v1168_v45, %v1145_v43  ;;  %v1559_v43 = vpack.c.bf16 (!%p1475_p8), %v1264_v40, %v1263_v39  ;;  %v1265_v44 = vmul.f32 (!%p1475_p8), 0.00390625, %v1235_v41  ;;  %v1266_v45 = vmul.f32 (!%p1475_p8), 0.00390625, %v1236_v42 }
 0x401   : > { %v1170_v47 = vpop.xlane.xlu0 %1169 }
 0x402   : > { %1209 = vst.msk [vmem:[#allocation2 + $0xa0] sm:$0xff] %vm1076_vm3, %v1193_v12  ;;  %v1194_v48 = vadd.f32 %v1170_v47, %v1146_v46  ;;  %v1237_v46 = vld [vmem:[#allocation2 + $0x70] sm:$0xff] (!%p1475_p8)  ;;  %1560 = vmatpush1.bf16.msra.mxu0 (!%p1475_p8), %v1559_v43  ;;  %v1562_v47 = vpack.c.bf16 (!%p1475_p8), %v1266_v45, %v1265_v44 }
 0x403   : > { %v1164_v13 = vpop.xlane.xlu1 %1163  ;;  %v1238_v12 = vld [vmem:[#allocation2 + $0x78] sm:$0xff] (!%p1475_p8)  ;;  %1561 = vmatprep.subr.bf16.mxu0 (!%p1475_p8), %v1709_v62 }
 0x404   : > { %1210 = vst.msk [vmem:[#allocation2 + $0xa8] sm:$0xff] %vm1076_vm3, %v1194_v48  ;;  %v1191_v49 = vadd.f32 %v1164_v13, %v1143_v10  ;;  %v1267_v10 = vmul.f32 (!%p1475_p8), 0.00390625, %v1237_v46  ;;  %v1268_v48 = vmul.f32 (!%p1475_p8), 0.00390625, %v1238_v12  ;;  %v1239_v13 = vld [vmem:[#allocation2 + $0x80] sm:$0xff] (!%p1475_p8) }
 0x405   : > { %v1166_v50 = vpop.xlane.xlu0 %1165  ;;  %v1249_v25 = vld [vmem:[#allocation2 + $0xd0] sm:$0xff] (!%p1475_p8) }
 0x406   : > { %1207 = vst.msk [vmem:[#allocation2 + $0x90] sm:$0xff] %vm1076_vm3, %v1191_v49  ;;  %v1192_v16 = vadd.f32 %v1166_v50, %v1144_v11  ;;  %v1240_v11 = vld [vmem:[#allocation2 + $0x88] sm:$0xff] (!%p1475_p8)  ;;  %1563 = vmatpush1.bf16.msra.mxu0 (!%p1475_p8), %v1562_v47  ;;  %v1565_v49 = vpack.c.bf16 (!%p1475_p8), %v1268_v48, %v1267_v10  ;;  %v1269_v50 = vmul.f32 (!%p1475_p8), 0.00390625, %v1239_v13  ;;  %v1279_v0 = vmul.f32 (!%p1475_p8), 0.00390625, %v1249_v25 }
 0x407   : > { %v1176_v52 = vpop.xlane.xlu1 %1175  ;;  %1564 = vmatprep.subr.bf16.mxu0 (!%p1475_p8), %v1709_v62  ;;  %v1250_v63 = vld [vmem:[#allocation2 + $0xd8] sm:$0xff] (!%p1475_p8) }
 0x408   : > { %1208 = vst.msk [vmem:[#allocation2 + $0x98] sm:$0xff] %vm1076_vm3, %v1192_v16  ;;  %v1197_v53 = vadd.f32 %v1176_v52, %v1149_v51  ;;  %v1270_v51 = vmul.f32 (!%p1475_p8), 0.00390625, %v1240_v11  ;;  %v1280_v23 = vmul.f32 (!%p1475_p8), 0.00390625, %v1250_v63 }
 0x409   : > { %v1178_v14 = vpop.xlane.xlu0 %1177 }
 0x40a   : > { %1213 = vst.msk [vmem:[#allocation2 + $0xc0] sm:$0xff] %vm1076_vm3, %v1197_v53  ;;  %v1198_v18 = vadd.f32 %v1178_v14, %v1150_v20  ;;  %1566 = vmatpush1.bf16.msra.mxu0 (!%p1475_p8), %v1565_v49  ;;  %v1568_v20 = vpack.c.bf16 (!%p1475_p8), %v1270_v51, %v1269_v50  ;;  %v1583_v24 = vpack.c.bf16 (!%p1475_p8), %v1280_v23, %v1279_v0 }
 0x40b   : > { %v1172_v17 = vpop.xlane.xlu1 %1171  ;;  %1567 = vmatprep.subr.bf16.mxu0 (!%p1475_p8), %v1709_v62 }
 0x40c   : > { %1214 = vst.msk [vmem:[#allocation2 + $0xc8] sm:$0xff] %vm1076_vm3, %v1198_v18  ;;  %v1195_v54 = vadd.f32 %v1172_v17, %v1147_v15  ;;  %v1243_v15 = vld [vmem:[#allocation2 + $0xa0] sm:$0xff] (!%p1475_p8)  ;;  %v1244_v18 = vld [vmem:[#allocation2 + $0xa8] sm:$0xff] (!%p1475_p8) }
 0x40d   : > { %v1174_v55 = vpop.xlane.xlu0 %1173  ;;  %v1241_v16 = vld [vmem:[#allocation2 + $0x90] sm:$0xff] (!%p1475_p8) }
 0x40e   : > { %1211 = vst.msk [vmem:[#allocation2 + $0xb0] sm:$0xff] %vm1076_vm3, %v1195_v54  ;;  %v1196_v56 = vadd.f32 %v1174_v55, %v1148_v21  ;;  %1222 = sbr.rel (%p1475_p8) target bundleno = 1308 (0x51c), region = 72  ;;  %v1271_v53 = vmul.f32 (!%p1475_p8), 0.00390625, %v1241_v16  ;;  %1569 = vmatpush1.bf16.msra.mxu0 (!%p1475_p8), %v1568_v20  ;;  %v1273_v21 = vmul.f32 (!%p1475_p8), 0.00390625, %v1243_v15  ;;  %v1274_v54 = vmul.f32 (!%p1475_p8), 0.00390625, %v1244_v18 }
 0x40f   : > { %v1184_v31 = vpop.xlane.xlu1 %1183  ;;  %v1242_v52 = vld [vmem:[#allocation2 + $0x98] sm:$0xff] (!%p1475_p8)  ;;  %1570 = vmatprep.subr.bf16.mxu0 (!%p1475_p8), %v1709_v62 }
 0x410   : > { %1212 = vst.msk [vmem:[#allocation2 + $0xb8] sm:$0xff] %vm1076_vm3, %v1196_v56  ;;  %v1201_v58 = vadd.f32 %v1184_v31, %v1153_v19  ;;  %v1272_v14 = vmul.f32 (!%p1475_p8), 0.00390625, %v1242_v52  ;;  %v1574_v56 = vpack.c.bf16 (!%p1475_p8), %v1274_v54, %v1273_v21 }
 0x411   : > { %v1186_v32 = vpop.xlane.xlu0 %1185 }
 0x412   : > { %1217 = vst.msk [vmem:[#allocation2 + $0xe0] sm:$0xff] %vm1076_vm3, %v1201_v58  ;;  %v1202_v59 = vadd.f32 %v1186_v32, %v1154_v57  ;;  %v1571_v17 = vpack.c.bf16 (!%p1475_p8), %v1272_v14, %v1271_v53  ;;  %v1247_v58 = vld [vmem:[#allocation2 + $0xc0] sm:$0xff] (!%p1475_p8) }
 0x413   : > { %v1248_v32 = vld [vmem:[#allocation2 + $0xc8] sm:$0xff] (!%p1475_p8)  ;;  %v1277_v60 = vmul.f32 (!%p1475_p8), 0.00390625, %v1247_v58 }
 0x414   : > { %1218 = vst.msk [vmem:[#allocation2 + $0xe8] sm:$0xff] %vm1076_vm3, %v1202_v59  ;;  %1572 = vmatpush1.bf16.msra.mxu0 (!%p1475_p8), %v1571_v17  ;;  %v1278_v61 = vmul.f32 (!%p1475_p8), 0.00390625, %v1248_v32 }
 0x415   : > { %v1245_v55 = vld [vmem:[#allocation2 + $0xb0] sm:$0xff]  ;;  %1573 = vmatprep.subr.bf16.mxu0 %v1709_v62 }
 0x416   : > { %v1275_v31 = vmul.f32 0.00390625, %v1245_v55  ;;  %v1580_v26 = vpack.c.bf16 %v1278_v61, %v1277_v60 }
 0x417   : > { %v1246_v19 = vld [vmem:[#allocation2 + $0xb8] sm:$0xff] }
 0x418   : > { %v1276_v57 = vmul.f32 0.00390625, %v1246_v19  ;;  %1575 = vmatpush1.bf16.msra.mxu0 %v1574_v56 }
 0x419   : > { %1576 = vmatprep.subr.bf16.mxu0 %v1709_v62  ;;  %v1251_v1 = vld [vmem:[#allocation2 + $0xe0] sm:$0xff] }
 0x41a   : > { %v1577_v59 = vpack.c.bf16 %v1276_v57, %v1275_v31  ;;  %v1281_v3 = vmul.f32 0.00390625, %v1251_v1 }
 0x41b   : > { %v1252_v2 = vld [vmem:[#allocation2 + $0xe8] sm:$0xff] }
 0x41c   : > { %1578 = vmatpush1.bf16.msra.mxu0 %v1577_v59  ;;  %v1282_v29 = vmul.f32 0.00390625, %v1252_v2 }
 0x41d   : > { %1579 = vmatprep.subr.bf16.mxu0 %v1709_v62 }
 0x41e   : > { %v1586_v4 = vpack.c.bf16 %v1282_v29, %v1281_v3 }
 0x420   : > { %1581 = vmatpush1.bf16.msra.mxu0 %v1580_v26 }
 0x421   : > { %1582 = vmatprep.subr.bf16.mxu0 %v1709_v62 }
 0x424   : > { %1584 = vmatpush1.bf16.msra.mxu0 %v1583_v24 }
 0x425   : > { %1585 = vmatprep.subr.bf16.mxu0 %v1709_v62 }
 0x428   : > { %1587 = vmatpush1.bf16.msra.mxu0 %v1586_v4 }
 0x42b   : > { %1355 = vmatmul.mubr.f32.vlgmr.msra.gmra.mrb[0].mxu0 %v1283_v5 }
 0x4fe   : > { %v1356_v6 = vpop.f32.mrb[0].mxu0 }
 0x4ff   : > { %v1357_v27 = vadd.f32 %v1356_v6, %v1285_v30  ;;  %v1358_v7 = vpop.f32.mrb[1].mxu0 }
 0x501   : > { %v1477_v8 = vmul.f32 -1.442695, %v1357_v27 }
 0x503   : > { %1661 = vpow2.f32 %v1477_v8 }
 0x50d   : > { %v1662_v9 = vpop.eup %1661 }
 0x50e   : > { %v1363_v28 = vadd.f32 1.0, %v1662_v9 }
 0x510   : > { %1663 = vrcp.f32 %v1363_v28 }
 0x51a   : > { %v1664_v62 = vpop.eup %1663 }
 0x51b   : > { %1367 = vst.msk [vmem:[%s1807_s30] sm:$0x1f] %vm1366_vm6, %v1664_v62 }
 0x51c PF: > { %s21_s21 = sadd.s32 1, %s1703_s21   ;;  %s2153_s17 = smov %s1695_s19 }
 0x51d   : > { %p18_p9 = scmp.ge.s32.totalorder %s21_s21, 6   ;;  %s2154_s18 = smov %s1699_s20 }
 0x51e   : > { %s2155_s19 = smov %s2158_s22  ;;  %s2156_s20 = smov %s2162_s23 }
 0x51f   :  { %20 = sbr.rel (!%p18_p9) target bundleno = 3 (0x3), region = 102 }

</bundles_post_ra>
